<compile_context>
chip_gen: v7x
topology: tpu7x:2x2x1
jax: 0.10.0
libtpu: 0.0.40
codegen_flags: <defaults>
</compile_context>

<pallas_src>
import functools

import jax
import jax.numpy as jnp
from jax.experimental import pallas as pl
from jax.experimental.pallas import tpu as pltpu


# ----------------------------------------------------------------------------
# "__init__" equivalent: build spline parameters in plain JAX (deterministic).
# ----------------------------------------------------------------------------
def make_spline_params(xk, f, x1=-2.0, x2=2.0):
    """Replicates CubicSpline.__init__ / _solve_linear_system and precomputes the
    per-interval Horner coefficients (baked into the kernel as constants)."""
    xk = jnp.asarray(xk, jnp.float32)
    yk = f(xk).astype(jnp.float32)

    # d f(x)/dx at the knots (torch.autograd.grad with ones cotangent on an
    # elementwise f is just the elementwise derivative).
    dfdx = jax.vmap(jax.grad(lambda v: f(v)))(xk).astype(jnp.float32)

    y0s = dfdx[0] * (xk[1] - xk[0])
    yns = dfdx[-1] * (xk[-1] - xk[-2])

    n = yk.shape[0]
    A = (4.0 * jnp.eye(n - 2, dtype=jnp.float32)
         + jnp.diag(jnp.ones(n - 3, dtype=jnp.float32), 1)
         + jnp.diag(jnp.ones(n - 3, dtype=jnp.float32), -1))
    b = 3.0 * (yk[2:] - yk[:-2])
    b = b.at[0].add(-y0s)
    b = b.at[n - 3].add(-yns)
    c = jnp.linalg.solve(A, b)
    ys = jnp.concatenate([y0s[None], c, yns[None]]).astype(jnp.float32)

    # Uniform-knot index arithmetic in the kernel assumes equally spaced knots.
    dx = float(xk[1] - xk[0])
    max_dev = float(jnp.max(jnp.abs(jnp.diff(xk) - dx)))
    assert max_dev < 1e-6 * abs(dx), "kernel assumes uniformly spaced knots"
    # TODO(synk): non-uniform knots would need a searchsorted-style interval lookup instead
    # of the uniform floor((t - x0) / dx) index computation.

    # Per-interval Hermite polynomial in Horner form: ((c3*tt + c2)*tt + c1)*tt + c0
    y0 = yk[:-1]
    y1v = yk[1:]
    s0 = ys[:-1]
    s1 = ys[1:]
    c3 = 2.0 * y0 - 2.0 * y1v + s0 + s1
    c2 = -3.0 * y0 + 3.0 * y1v - 2.0 * s0 - s1
    c1 = s0
    c0 = y0

    # End values for linear extrapolation (matches torch: f(x1), f(x2)); fold the -x1/-x2.
    y1 = float(f(jnp.float32(x1)))
    y2 = float(f(jnp.float32(x2)))

    coeffs = tuple(
        (float(c3[i]), float(c2[i]), float(c1[i]), float(c0[i]))
        for i in range(n - 1))

    return dict(
        xk=xk, yk=yk, ys=ys,
        c3=c3, c2=c2, c1=c1, c0=c0,          # jnp arrays (reference / tail epilogue)
        coeffs=coeffs,                        # python floats baked into the kernel
        x0=float(xk[0]), inv_dx=1.0 / dx,
        x1=float(x1), x2=float(x2),
        y1=y1, y2=y2,
        end_lo=y1 - float(x1), end_hi=y2 - float(x2),
        n_int=int(n - 1),
    )


# ----------------------------------------------------------------------------
# Pallas kernel: uniform-knot interval index + baked-constant Horner + linear extrapolation.
# ----------------------------------------------------------------------------
def _spline_kernel(t_ref, o_ref, *, coeffs, x0, inv_dx, x1, x2, end_lo, end_hi):
    n_int = len(coeffs)

    t = t_ref[...].astype(jnp.float32)   # cast immediately after load (v5e has no bf16 VPU)

    # Interval index (kept as float: no f32->s32 convert) and local parameter.
    u = (t - x0) * inv_dx
    idxf = jnp.clip(jnp.floor(u), 0.0, float(n_int - 1))
    tt = u - idxf

    # Coefficient "gather": seed with interval 0 and override with a short chain of
    # constant-operand selects (idxf >= i), all constants are compile-time immediates.
    c3_0, c2_0, c1_0, c0_0 = coeffs[0]
    c3 = jnp.full_like(t, c3_0)
    c2 = jnp.full_like(t, c2_0)
    c1 = jnp.full_like(t, c1_0)
    c0 = jnp.full_like(t, c0_0)
    for i in range(1, n_int):
        m = idxf >= float(i)
        ci3, ci2, ci1, ci0 = coeffs[i]
        c3 = jnp.where(m, ci3, c3)
        c2 = jnp.where(m, ci2, c2)
        c1 = jnp.where(m, ci1, c1)
        c0 = jnp.where(m, ci0, c0)

    s = ((c3 * tt + c2) * tt + c1) * tt + c0

    # Linear extrapolation outside [x1, x2]; end_lo = f(x1) - x1, end_hi = f(x2) - x2.
    out = jnp.where(t < x1, t + end_lo, jnp.where(t > x2, t + end_hi, s))
    o_ref[...] = out.astype(o_ref.dtype)


# Plain-JAX epilogue for the <512-element ragged tail (avoids padding the whole array).
def _eval_spline_jax(tv, params):
    tf32 = tv.astype(jnp.float32)
    u = (tf32 - params["x0"]) * params["inv_dx"]
    idxf = jnp.clip(jnp.floor(u), 0.0, float(params["n_int"] - 1))
    tt = u - idxf
    idx = idxf.astype(jnp.int32)
    c3 = params["c3"][idx]
    c2 = params["c2"][idx]
    c1 = params["c1"][idx]
    c0 = params["c0"][idx]
    s = ((c3 * tt + c2) * tt + c1) * tt + c0
    return jnp.where(tf32 < params["x1"], tf32 + params["end_lo"],
                     jnp.where(tf32 > params["x2"], tf32 + params["end_hi"], s))


def cubic_spline_forward(t, params):
    """Applies the spline elementwise to t (any shape, any float dtype)."""
    orig_shape = t.shape
    orig_dtype = t.dtype
    tf = t.reshape(-1)
    total = tf.shape[0]

    W = 512          # lane-dense last dim (multiple of 128 -> wide unmasked stores)
    MAX_TR = 2048    # up to 2048*512*4B = 4 MiB per f32 input tile

    main = (total // W) * W
    tail = total - main

    pieces = []
    if main:
        rows = main // W
        t_main = tf if tail == 0 else tf[:main]
        t2d = t_main.reshape(rows, W)

        itemsize = int(jnp.dtype(orig_dtype).itemsize)
        sub = max(8, 32 // max(itemsize, 1))   # sublane multiple: 8 (f32), 16 (bf16), 32 (i8)

        if rows <= sub:
            tr = rows                 # single block == full array dims (allowed)
            num_tiles = 1
        else:
            # >= 2 tiles whenever possible so v7x's two TensorCores both get work.
            tr = min(MAX_TR, pl.cdiv(pl.cdiv(rows, 2), sub) * sub)
            num_tiles = pl.cdiv(rows, tr)      # partial last block handled by Pallas

        kernel = functools.partial(
            _spline_kernel,
            coeffs=params["coeffs"], x0=params["x0"], inv_dx=params["inv_dx"],
            x1=params["x1"], x2=params["x2"],
            end_lo=params["end_lo"], end_hi=params["end_hi"])

        out2d = pl.pallas_call(
            kernel,
            out_shape=jax.ShapeDtypeStruct((rows, W), orig_dtype),
            grid=(num_tiles,),
            in_specs=[pl.BlockSpec((tr, W), lambda i: (i, 0))],
            out_specs=pl.BlockSpec((tr, W), lambda i: (i, 0)),
            compiler_params=pltpu.CompilerParams(
                dimension_semantics=("parallel",),
                vmem_limit_bytes=48 * 1024 * 1024),
        )(t2d)
        pieces.append(out2d.reshape(-1))

    if tail:
        pieces.append(_eval_spline_jax(tf[main:], params).astype(orig_dtype))

    out_flat = pieces[0] if len(pieces) == 1 else jnp.concatenate(pieces)
    return out_flat.reshape(orig_shape)


# ----------------------------------------------------------------------------
# Pure-JAX reference (mirrors the torch forward exactly) for a sanity check.
# ----------------------------------------------------------------------------
def cubic_spline_reference(t, params):
    xk, yk, ys = params["xk"], params["yk"], params["ys"]
    x1, x2, y1, y2 = params["x1"], params["x2"], params["y1"], params["y2"]
    n = xk.shape[0]
    tf = t.astype(jnp.float32)
    s = jnp.zeros_like(tf)
    for i in range(n - 1):
        tt = (tf - xk[i]) / (xk[i + 1] - xk[i])
        h = (tt ** 3 * (2 * yk[i] - 2 * yk[i + 1] + ys[i] + ys[i + 1])
             + tt ** 2 * (-3 * yk[i] + 3 * yk[i + 1] - 2 * ys[i] - ys[i + 1])
             + tt * ys[i] + yk[i])
        s = jnp.where((xk[i] <= tf) & (tf <= xk[i + 1]), h, s)
    out = jnp.where(tf < x1, y1 + tf - x1, jnp.where(tf > x2, y2 + tf - x2, s))
    return out.astype(t.dtype)


if __name__ == "__main__":
    # Deterministic construction: knots on [-2, 2], f = sin.
    f = jnp.sin
    knots = jnp.linspace(-2.0, 2.0, 9).astype(jnp.float32)
    params = make_spline_params(knots, f)

    # Example input t: NCHW-shaped tensor spanning all branches (interior + both extrapolations).
    key = jax.random.PRNGKey(0)
    t = jax.random.uniform(key, (2, 4, 16, 16), dtype=jnp.float32,
                           minval=-3.0, maxval=3.0)
    # Lock in exact knot-boundary / endpoint behavior (FP rounding at interval edges).
    boundary_vals = jnp.concatenate([knots, jnp.array([-2.0, 2.0], jnp.float32)])
    t = t.reshape(-1).at[:boundary_vals.shape[0]].set(boundary_vals).reshape(2, 4, 16, 16)

    out = cubic_spline_forward(t, params)
    out = jax.block_until_ready(out)

    ref = cubic_spline_reference(t, params)
    assert out.shape == t.shape and out.dtype == t.dtype
    err = float(jnp.max(jnp.abs(out - ref)))
    assert err < 1e-5, err

    print("KERNEL_OK")
</pallas_src>

<mosaic_0001>
module attributes {stable_mosaic.version = 11 : i64} {
  func.func @_spline_kernel(%arg0: i32, %arg1: memref<4x512xf32, #tpu.memory_space<vmem>>, %arg2: memref<4x512xf32, #tpu.memory_space<vmem>>) attributes {dimension_semantics = [#tpu.dimension_semantics<parallel>], iteration_bounds = array<i64: 1>, scalar_prefetch = 0 : i64, scratch_operands = 0 : i64, tpu.core_type = #tpu.core_type<tc>, window_params = [{transform_indices = @transform_0, window_bounds = array<i64: 4, 512>}, {transform_indices = @transform_1, window_bounds = array<i64: 4, 512>}]} {
    %c0 = arith.constant 0 : index
    %c0_0 = arith.constant 0 : index
    %0 = vector.load %arg1[%c0, %c0_0] : memref<4x512xf32, #tpu.memory_space<vmem>>, vector<4x512xf32>
    %cst = arith.constant -2.000000e+00 : f32
    %1 = vector.broadcast %cst : f32 to vector<4x512xf32>
    %2 = arith.subf %0, %1 : vector<4x512xf32>
    %cst_1 = arith.constant 2.000000e+00 : f32
    %3 = vector.broadcast %cst_1 : f32 to vector<4x512xf32>
    %4 = arith.mulf %2, %3 : vector<4x512xf32>
    %5 = math.floor %4 : vector<4x512xf32>
    %cst_2 = arith.constant 0.000000e+00 : f32
    %cst_3 = arith.constant 7.000000e+00 : f32
    %6 = vector.broadcast %cst_2 : f32 to vector<4x512xf32>
    %7 = arith.maximumf %6, %5 : vector<4x512xf32>
    %8 = vector.broadcast %cst_3 : f32 to vector<4x512xf32>
    %9 = arith.minimumf %8, %7 : vector<4x512xf32>
    %10 = arith.subf %4, %9 : vector<4x512xf32>
    %cst_4 = arith.constant 0.00369766355 : f32
    %11 = vector.broadcast %cst_4 : f32 to vector<4x512xf32>
    %cst_5 = arith.constant 0.116178051 : f32
    %12 = vector.broadcast %cst_5 : f32 to vector<4x512xf32>
    %cst_6 = arith.constant -0.208073422 : f32
    %13 = vector.broadcast %cst_6 : f32 to vector<4x512xf32>
    %cst_7 = arith.constant -0.909297406 : f32
    %14 = vector.broadcast %cst_7 : f32 to vector<4x512xf32>
    %cst_8 = arith.constant 1.000000e+00 : f32
    %15 = vector.broadcast %cst_8 : f32 to vector<4x512xf32>
    %16 = arith.cmpf oge, %9, %15 : vector<4x512xf32>
    %cst_9 = arith.constant -0.00662302971 : f32
    %17 = vector.broadcast %cst_9 : f32 to vector<4x512xf32>
    %18 = arith.select %16, %17, %11 : vector<4x512xi1>, vector<4x512xf32>
    %cst_10 = arith.constant 0.127271205 : f32
    %19 = vector.broadcast %cst_10 : f32 to vector<4x512xf32>
    %20 = arith.select %16, %19, %12 : vector<4x512xi1>, vector<4x512xf32>
    %cst_11 = arith.constant 0.035375908 : f32
    %21 = vector.broadcast %cst_11 : f32 to vector<4x512xf32>
    %22 = arith.select %16, %21, %13 : vector<4x512xi1>, vector<4x512xf32>
    %cst_12 = arith.constant -0.997494995 : f32
    %23 = vector.broadcast %cst_12 : f32 to vector<4x512xf32>
    %24 = arith.select %16, %23, %14 : vector<4x512xi1>, vector<4x512xf32>
    %cst_13 = arith.constant 2.000000e+00 : f32
    %25 = vector.broadcast %cst_13 : f32 to vector<4x512xf32>
    %26 = arith.cmpf oge, %9, %25 : vector<4x512xf32>
    %cst_14 = arith.constant -0.0154058635 : f32
    %27 = vector.broadcast %cst_14 : f32 to vector<4x512xf32>
    %28 = arith.select %26, %27, %18 : vector<4x512xi1>, vector<4x512xf32>
    %cst_15 = arith.constant 0.107402116 : f32
    %29 = vector.broadcast %cst_15 : f32 to vector<4x512xf32>
    %30 = arith.select %26, %29, %20 : vector<4x512xi1>, vector<4x512xf32>
    %cst_16 = arith.constant 0.270049155 : f32
    %31 = vector.broadcast %cst_16 : f32 to vector<4x512xf32>
    %32 = arith.select %26, %31, %22 : vector<4x512xi1>, vector<4x512xf32>
    %cst_17 = arith.constant -0.841470957 : f32
    %33 = vector.broadcast %cst_17 : f32 to vector<4x512xf32>
    %34 = arith.select %26, %33, %24 : vector<4x512xi1>, vector<4x512xf32>
    %cst_18 = arith.constant 3.000000e+00 : f32
    %35 = vector.broadcast %cst_18 : f32 to vector<4x512xf32>
    %36 = arith.cmpf oge, %9, %35 : vector<4x512xf32>
    %cst_19 = arith.constant -0.0203948617 : f32
    %37 = vector.broadcast %cst_19 : f32 to vector<4x512xf32>
    %38 = arith.select %36, %37, %28 : vector<4x512xi1>, vector<4x512xf32>
    %cst_20 = arith.constant 0.0611846446 : f32
    %39 = vector.broadcast %cst_20 : f32 to vector<4x512xf32>
    %40 = arith.select %36, %39, %30 : vector<4x512xi1>, vector<4x512xf32>
    %cst_21 = arith.constant 0.438635796 : f32
    %41 = vector.broadcast %cst_21 : f32 to vector<4x512xf32>
    %42 = arith.select %36, %41, %32 : vector<4x512xi1>, vector<4x512xf32>
    %cst_22 = arith.constant -0.47942555 : f32
    %43 = vector.broadcast %cst_22 : f32 to vector<4x512xf32>
    %44 = arith.select %36, %43, %34 : vector<4x512xi1>, vector<4x512xf32>
    %cst_23 = arith.constant 4.000000e+00 : f32
    %45 = vector.broadcast %cst_23 : f32 to vector<4x512xf32>
    %46 = arith.cmpf oge, %9, %45 : vector<4x512xf32>
    %cst_24 = arith.constant -0.0203948319 : f32
    %47 = vector.broadcast %cst_24 : f32 to vector<4x512xf32>
    %48 = arith.select %46, %47, %38 : vector<4x512xi1>, vector<4x512xf32>
    %cst_25 = arith.constant -2.98023224E-8 : f32
    %49 = vector.broadcast %cst_25 : f32 to vector<4x512xf32>
    %50 = arith.select %46, %49, %40 : vector<4x512xi1>, vector<4x512xf32>
    %cst_26 = arith.constant 0.499820411 : f32
    %51 = vector.broadcast %cst_26 : f32 to vector<4x512xf32>
    %52 = arith.select %46, %51, %42 : vector<4x512xi1>, vector<4x512xf32>
    %cst_27 = arith.constant 0.000000e+00 : f32
    %53 = vector.broadcast %cst_27 : f32 to vector<4x512xf32>
    %54 = arith.select %46, %53, %44 : vector<4x512xi1>, vector<4x512xf32>
    %cst_28 = arith.constant 5.000000e+00 : f32
    %55 = vector.broadcast %cst_28 : f32 to vector<4x512xf32>
    %56 = arith.cmpf oge, %9, %55 : vector<4x512xf32>
    %cst_29 = arith.constant -0.0154058337 : f32
    %57 = vector.broadcast %cst_29 : f32 to vector<4x512xf32>
    %58 = arith.select %56, %57, %48 : vector<4x512xi1>, vector<4x512xf32>
    %cst_30 = arith.constant -0.0611846148 : f32
    %59 = vector.broadcast %cst_30 : f32 to vector<4x512xf32>
    %60 = arith.select %56, %59, %50 : vector<4x512xi1>, vector<4x512xf32>
    %cst_31 = arith.constant 0.438635856 : f32
    %61 = vector.broadcast %cst_31 : f32 to vector<4x512xf32>
    %62 = arith.select %56, %61, %52 : vector<4x512xi1>, vector<4x512xf32>
    %cst_32 = arith.constant 0.47942555 : f32
    %63 = vector.broadcast %cst_32 : f32 to vector<4x512xf32>
    %64 = arith.select %56, %63, %54 : vector<4x512xi1>, vector<4x512xf32>
    %cst_33 = arith.constant 6.000000e+00 : f32
    %65 = vector.broadcast %cst_33 : f32 to vector<4x512xf32>
    %66 = arith.cmpf oge, %9, %65 : vector<4x512xf32>
    %cst_34 = arith.constant -0.00662304088 : f32
    %67 = vector.broadcast %cst_34 : f32 to vector<4x512xf32>
    %68 = arith.select %66, %67, %58 : vector<4x512xi1>, vector<4x512xf32>
    %cst_35 = arith.constant -0.107401982 : f32
    %69 = vector.broadcast %cst_35 : f32 to vector<4x512xf32>
    %70 = arith.select %66, %69, %60 : vector<4x512xi1>, vector<4x512xf32>
    %cst_36 = arith.constant 0.270049125 : f32
    %71 = vector.broadcast %cst_36 : f32 to vector<4x512xf32>
    %72 = arith.select %66, %71, %62 : vector<4x512xi1>, vector<4x512xf32>
    %cst_37 = arith.constant 0.841470957 : f32
    %73 = vector.broadcast %cst_37 : f32 to vector<4x512xf32>
    %74 = arith.select %66, %73, %64 : vector<4x512xi1>, vector<4x512xf32>
    %cst_38 = arith.constant 7.000000e+00 : f32
    %75 = vector.broadcast %cst_38 : f32 to vector<4x512xf32>
    %76 = arith.cmpf oge, %9, %75 : vector<4x512xf32>
    %cst_39 = arith.constant 0.00369766355 : f32
    %77 = vector.broadcast %cst_39 : f32 to vector<4x512xf32>
    %78 = arith.select %76, %77, %68 : vector<4x512xi1>, vector<4x512xf32>
    %cst_40 = arith.constant -0.12727128 : f32
    %79 = vector.broadcast %cst_40 : f32 to vector<4x512xf32>
    %80 = arith.select %76, %79, %70 : vector<4x512xi1>, vector<4x512xf32>
    %cst_41 = arith.constant 0.0353759117 : f32
    %81 = vector.broadcast %cst_41 : f32 to vector<4x512xf32>
    %82 = arith.select %76, %81, %72 : vector<4x512xi1>, vector<4x512xf32>
    %cst_42 = arith.constant 0.997494995 : f32
    %83 = vector.broadcast %cst_42 : f32 to vector<4x512xf32>
    %84 = arith.select %76, %83, %74 : vector<4x512xi1>, vector<4x512xf32>
    %85 = arith.mulf %78, %10 : vector<4x512xf32>
    %86 = arith.addf %85, %80 : vector<4x512xf32>
    %87 = arith.mulf %86, %10 : vector<4x512xf32>
    %88 = arith.addf %87, %82 : vector<4x512xf32>
    %89 = arith.mulf %88, %10 : vector<4x512xf32>
    %90 = arith.addf %89, %84 : vector<4x512xf32>
    %cst_43 = arith.constant -2.000000e+00 : f32
    %91 = vector.broadcast %cst_43 : f32 to vector<4x512xf32>
    %92 = arith.cmpf olt, %0, %91 : vector<4x512xf32>
    %cst_44 = arith.constant 1.09070253 : f32
    %93 = vector.broadcast %cst_44 : f32 to vector<4x512xf32>
    %94 = arith.addf %0, %93 : vector<4x512xf32>
    %cst_45 = arith.constant 2.000000e+00 : f32
    %95 = vector.broadcast %cst_45 : f32 to vector<4x512xf32>
    %96 = arith.cmpf ogt, %0, %95 : vector<4x512xf32>
    %cst_46 = arith.constant -1.09070253 : f32
    %97 = vector.broadcast %cst_46 : f32 to vector<4x512xf32>
    %98 = arith.addf %0, %97 : vector<4x512xf32>
    %99 = arith.select %96, %98, %90 : vector<4x512xi1>, vector<4x512xf32>
    %100 = arith.select %92, %94, %99 : vector<4x512xi1>, vector<4x512xf32>
    %c0_47 = arith.constant 0 : index
    %c0_48 = arith.constant 0 : index
    %101 = vector.load %arg2[%c0_47, %c0_48] : memref<4x512xf32, #tpu.memory_space<vmem>>, vector<4x512xf32>
    tpu.vector_store %arg2[%c0_47, %c0_48], %100 {strides = array<i32>} : memref<4x512xf32, #tpu.memory_space<vmem>>, vector<4x512xf32>,
    return
  }
  func.func @transform_0(%arg0: i32) -> (i32, i32) {
    %c0_i32 = arith.constant 0 : i32
    %c0_i32_0 = arith.constant 0 : i32
    return %arg0, %c0_i32 : i32, i32
  }
  func.func @transform_1(%arg0: i32) -> (i32, i32) {
    %c0_i32 = arith.constant 0 : i32
    %c0_i32_0 = arith.constant 0 : i32
    return %arg0, %c0_i32 : i32, i32
  }
}

</mosaic_0001>

<bundles_post_ra>
// kernel: tpu_custom_call.1
= control target key start
LH: loop header
LB: loop body
LE: loop exit
PB: predicated region body
PF: predicated region fallthrough
CT: control target
= control target key end

     0   :  { %6 = vsyncpa [#allocation3], 0  ;;  %s339_s0 = inlined_call_operand.hbm [shape: f32[4,512], index: 0, kind: input, shape index: {}]   ;;  %s340_s1 = inlined_call_operand.hbm [shape: f32[4,512], index: 1, kind: output, shape index: {}]  }
   0x1   :  { %7 = vsyncpa [#allocation4], 0  ;;  %s202_s6 = smov [#allocation2]   ;;  %s154_s10 = scalar_lea.hbm %s339_s0, 256 }
   0x2   :  { %s14_s7 = sshll.u32 %s202_s6, 4  ;;  %p155_p0 = scmp.ne.s32.totalorder %s339_s0, %s154_s10  ;;  %s15_s7 = int_to_ptr.vmem [resolvable:$true] %s14_s7 }
   0x3   :  { %p158_p1 = scmp.lt.u32.totalorder %s154_s10, %s339_s0 }
   0x5   :  { %p160_p2 = pnand %p158_p1, %p155_p0 }
   0x7   :  { %163 = shalt.err (!%p160_p2)
}
   0x8   :  { %s164_s15 = scalar_lea.vmem %s15_s7, 256  ;;  %p169_p4 = scmp.lt.s32.totalorder %s15_s7, %s15_s7 }
   0x9   :  { %p165_p3 = scmp.ne.s32.totalorder %s15_s7, %s164_s15  ;;  %p170_p5 = scmp.lt.s32.totalorder %s164_s15, %s164_s15 }
   0xb   :  { %p171_p6 = por %p170_p5, %p169_p4 }
   0xd   :  { %p172_p7 = pnand %p171_p6, %p165_p3 }
   0xf   :  { %175 = shalt.err (!%p172_p7)
}
  0x10   :  { %17 = dma.hbm_to_vmem [thread:$0]  %s339_s0, 256, %s15_s7, [#allocation3]  }
  0x11   :  { %198 = dma.done.wait [#allocation3], 256  }
  0x12   :  { %199 = vsyncadd [#allocation3], 4294967040  ;;  %v230_v0 = vld [vmem:[#allocation2] sm:$0xff]  ;;  %v232_v1 = vld [vmem:[#allocation2 + $0x8] sm:$0xff]  ;;  %v203_v13 = vmov 0.0036976635  }
  0x13   :  { %v146_v2 = vadd.f32 2.0, %v230_v0  ;;  %v147_v3 = vadd.f32 2.0, %v232_v1  ;;  %v242_v11 = vadd.f32 1.0907025, %v230_v0  ;;  %v204_v15 = vmov 0.11617805  }
  0x14   :  { %v205_v17 = vmov -0.20807342   ;;  %v206_v19 = vmov -0.9092974   ;;  %v123_v42 = vadd.f32 -1.0907025, %v230_v0 }
  0x15   :  { %v25_v4 = vmul.f32 2.0, %v146_v2  ;;  %v236_v5 = vmul.f32 2.0, %v147_v3  ;;  %vm121_vm14 = vcmp.gt.f32.partialorder %v230_v0, 2.0  ;;  %vm117_vm15 = vcmp.lt.f32.partialorder %v230_v0, -2.0  ;;  %s207_s0 = smov [#allocation5]  }
  0x16   :  { %s137_s18 = sshll.u32 %s207_s0, 4  ;;  %s138_s18 = int_to_ptr.vmem [resolvable:$true] %s137_s18 }
  0x17   :  { %v27_v6 = vfloor.f32 %v25_v4  ;;  %v28_v7 = vfloor.f32 %v236_v5  ;;  %s176_s19 = scalar_lea.vmem %s138_s18, 256  ;;  %p181_p9 = scmp.lt.s32.totalorder %s138_s18, %s138_s18 }
  0x18   :  { %p177_p8 = scmp.ne.s32.totalorder %s138_s18, %s176_s19  ;;  %p182_p10 = scmp.lt.s32.totalorder %s176_s19, %s176_s19 }
  0x19   :  { %v29_v8 = vmax.f32 %v27_v6, 0.0  ;;  %v30_v9 = vmax.f32 %v28_v7, 0.0 }
  0x1a   :  { %p183_p11 = por %p182_p10, %p181_p9 }
  0x1b   :  { %v239_v10 = vmin.f32 %v29_v8, 7.0  ;;  %v247_v12 = vmin.f32 %v30_v9, 7.0 }
  0x1c   :  { %p184_p12 = pnand %p183_p11, %p177_p8 }
  0x1d   :  { %vm35_vm0 = vcmp.ge.f32.partialorder %v239_v10, 1.0  ;;  %vm45_vm1 = vcmp.ge.f32.partialorder %v239_v10, 2.0  ;;  %vm55_vm2 = vcmp.ge.f32.partialorder %v239_v10, 3.0  ;;  %v33_v26 = vsub.f32 %v25_v4, %v239_v10 }
  0x1e   :  { %v37_v14 = vsel %vm35_vm0, -0.0066230297, %v203_v13  ;;  %v39_v16 = vsel %vm35_vm0, 0.1272712, %v204_v15  ;;  %v41_v18 = vsel %vm35_vm0, 0.035375908, %v205_v17  ;;  %v34_v58 = vsub.f32 %v236_v5, %v247_v12 }
  0x1f   :  { %v43_v20 = vsel %vm35_vm0, -0.997495, %v206_v19  ;;  %v47_v21 = vsel %vm45_vm1, -0.0154058635, %v37_v14  ;;  %v49_v22 = vsel %vm45_vm1, 0.107402116, %v39_v16 }
  0x20   :  { %v51_v23 = vsel %vm45_vm1, 0.27004915, %v41_v18  ;;  %v53_v24 = vsel %vm45_vm1, -0.84147096, %v43_v20  ;;  %v57_v25 = vsel %vm55_vm2, -0.020394862, %v47_v21 }
  0x21   :  { %v59_v27 = vsel %vm55_vm2, 0.061184645, %v49_v22  ;;  %v61_v28 = vsel %vm55_vm2, 0.4386358, %v51_v23  ;;  %v63_v29 = vsel %vm55_vm2, -0.47942555, %v53_v24 }
  0x22   :  { %vm65_vm3 = vcmp.ge.f32.partialorder %v239_v10, 4.0  ;;  %vm75_vm4 = vcmp.ge.f32.partialorder %v239_v10, 5.0  ;;  %vm85_vm5 = vcmp.ge.f32.partialorder %v239_v10, 6.0  ;;  %vm95_vm6 = vcmp.ge.f32.partialorder %v239_v10, 7.0 }
  0x23   :  { %v67_v30 = vsel %vm65_vm3, -0.020394832, %v57_v25  ;;  %v69_v31 = vsel %vm65_vm3, -2.9802322e-08, %v59_v27  ;;  %v71_v32 = vsel %vm65_vm3, 0.4998204, %v61_v28  ;;  %v73_v33 = vsel %vm65_vm3, 0.0, %v63_v29 }
  0x24   :  { %v77_v34 = vsel %vm75_vm4, -0.015405834, %v67_v30  ;;  %v79_v35 = vsel %vm75_vm4, -0.061184615, %v69_v31  ;;  %v81_v36 = vsel %vm75_vm4, 0.43863586, %v71_v32 }
  0x25   :  { %v83_v37 = vsel %vm75_vm4, 0.47942555, %v73_v33  ;;  %v87_v38 = vsel %vm85_vm5, -0.006623041, %v77_v34  ;;  %v89_v39 = vsel %vm85_vm5, -0.10740198, %v79_v35 }
  0x26   :  { %v91_v40 = vsel %vm85_vm5, 0.27004912, %v81_v36  ;;  %v97_v41 = vsel %vm95_vm6, 0.0036976635, %v87_v38  ;;  %v93_v43 = vsel %vm85_vm5, 0.84147096, %v83_v37 }
  0x27   :  { %v99_v44 = vsel %vm95_vm6, -0.12727128, %v89_v39  ;;  %v101_v45 = vsel %vm95_vm6, 0.03537591, %v91_v40  ;;  %v105_v46 = vmul.f32 %v97_v41, %v33_v26  ;;  %vm36_vm7 = vcmp.ge.f32.partialorder %v247_v12, 1.0 }
  0x28   :  { %vm46_vm8 = vcmp.ge.f32.partialorder %v247_v12, 2.0  ;;  %vm56_vm9 = vcmp.ge.f32.partialorder %v247_v12, 3.0  ;;  %vm66_vm10 = vcmp.ge.f32.partialorder %v247_v12, 4.0  ;;  %v38_v48 = vsel %vm36_vm7, -0.0066230297, %v203_v13 }
  0x29   :  { %v107_v47 = vadd.f32 %v105_v46, %v99_v44  ;;  %v40_v49 = vsel %vm36_vm7, 0.1272712, %v204_v15  ;;  %v42_v50 = vsel %vm36_vm7, 0.035375908, %v205_v17  ;;  %v44_v51 = vsel %vm36_vm7, -0.997495, %v206_v19 }
  0x2a   :  { %v48_v52 = vsel %vm46_vm8, -0.0154058635, %v38_v48  ;;  %v50_v53 = vsel %vm46_vm8, 0.107402116, %v40_v49  ;;  %v52_v55 = vsel %vm46_vm8, 0.27004915, %v42_v50 }
  0x2b   :  { %v109_v54 = vmul.f32 %v107_v47, %v33_v26  ;;  %v54_v56 = vsel %vm46_vm8, -0.84147096, %v44_v51  ;;  %v58_v57 = vsel %vm56_vm9, -0.020394862, %v48_v52  ;;  %v60_v59 = vsel %vm56_vm9, 0.061184645, %v50_v53 }
  0x2c   :  { %v62_v60 = vsel %vm56_vm9, 0.4386358, %v52_v55  ;;  %v64_v61 = vsel %vm56_vm9, -0.47942555, %v54_v56  ;;  %v68_v63 = vsel %vm66_vm10, -0.020394832, %v58_v57 }
  0x2d   :  { %v111_v62 = vadd.f32 %v109_v54, %v101_v45  ;;  %v70_v2 = vsel %vm66_vm10, -2.9802322e-08, %v60_v59  ;;  %v72_v3 = vsel %vm66_vm10, 0.4998204, %v62_v60  ;;  %v103_v4 = vsel %vm95_vm6, 0.997495, %v93_v43 }
  0x2e   :  { %vm76_vm11 = vcmp.ge.f32.partialorder %v247_v12, 5.0  ;;  %vm86_vm12 = vcmp.ge.f32.partialorder %v247_v12, 6.0  ;;  %vm96_vm13 = vcmp.ge.f32.partialorder %v247_v12, 7.0  ;;  %v74_v9 = vsel %vm66_vm10, 0.0, %v64_v61 }
  0x2f   :  { %v113_v5 = vmul.f32 %v111_v62, %v33_v26  ;;  %v78_v6 = vsel %vm76_vm11, -0.015405834, %v68_v63  ;;  %v80_v7 = vsel %vm76_vm11, -0.061184615, %v70_v2  ;;  %v82_v8 = vsel %vm76_vm11, 0.43863586, %v72_v3 }
  0x30   :  { %v88_v10 = vsel %vm86_vm12, -0.006623041, %v78_v6  ;;  %v90_v13 = vsel %vm86_vm12, -0.10740198, %v80_v7  ;;  %v92_v16 = vsel %vm86_vm12, 0.27004912, %v82_v8 }
  0x31   :  { %v115_v14 = vadd.f32 %v113_v5, %v103_v4  ;;  %v98_v15 = vsel %vm96_vm13, 0.0036976635, %v88_v10  ;;  %v100_v17 = vsel %vm96_vm13, -0.12727128, %v90_v13  ;;  %v84_v20 = vsel %vm76_vm11, 0.47942555, %v74_v9 }
  0x32   :  { %v106_v18 = vmul.f32 %v98_v15, %v34_v58  ;;  %v102_v0 = vsel %vm96_vm13, 0.03537591, %v92_v16  ;;  %v94_v23 = vsel %vm86_vm12, 0.84147096, %v84_v20  ;;  %v124_v28 = vadd.f32 -1.0907025, %v232_v1 }
  0x33   :  { %v125_v19 = vsel %vm121_vm14, %v123_v42, %v115_v14  ;;  %v104_v26 = vsel %vm96_vm13, 0.997495, %v94_v23  ;;  %v120_v29 = vadd.f32 1.0907025, %v232_v1  ;;  %vm122_vm0 = vcmp.gt.f32.partialorder %v232_v1, 2.0 }
  0x34   :  { %v127_v21 = vsel %vm117_vm15, %v242_v11, %v125_v19  ;;  %v108_v22 = vadd.f32 %v106_v18, %v100_v17  ;;  %vm118_vm1 = vcmp.lt.f32.partialorder %v232_v1, -2.0 }
  0x35   :  { %129 = vst [vmem:[#allocation5] sm:$0xff] %v127_v21 }
  0x36   :  { %v110_v24 = vmul.f32 %v108_v22, %v34_v58 }
  0x38   :  { %v112_v25 = vadd.f32 %v110_v24, %v102_v0 }
  0x3a   :  { %v114_v27 = vmul.f32 %v112_v25, %v34_v58 }
  0x3c   :  { %v116_v11 = vadd.f32 %v114_v27, %v104_v26 }
  0x3e   :  { %v126_v30 = vsel %vm122_vm0, %v124_v28, %v116_v11 }
  0x3f   :  { %v128_v31 = vsel %vm118_vm1, %v120_v29, %v126_v30 }
  0x40   :  { %130 = vst [vmem:[#allocation5 + $0x8] sm:$0xff] %v128_v31 }
  0x41   :  { %187 = shalt.err (!%p184_p12)
}
  0x42   :  { %s188_s22 = scalar_lea.hbm %s340_s1, 256 }
  0x43   :  { %p189_p13 = scmp.ne.s32.totalorder %s340_s1, %s188_s22  ;;  %p192_p0 = scmp.lt.u32.totalorder %s188_s22, %s340_s1 }
  0x45   :  { %p194_p1 = pnand %p192_p0, %p189_p13 }
  0x47   :  { %197 = shalt.err (!%p194_p1)
}
  0x48   :  { %140 = dma.vmem_to_hbm [thread:$0]  %s138_s18, 256, %s340_s1, [#allocation4]  }
  0x49   :  { %200 = dma.done.wait [#allocation4], 256  }
  0x4a   :  { %201 = vsyncadd [#allocation4], 4294967040 }
  0x4b   :  { %144 = vsyncpa [#allocation3], 1 }
  0x4c   :  { %145 = vsyncpa [#allocation4], 1 }

</bundles_post_ra>
